<compile_context>
chip_gen: v7x
topology: tpu7x:2x2x1
jax: 0.10.0
libtpu: 0.0.40
codegen_flags: <defaults>
</compile_context>

<pallas_src>
import functools

import jax
import jax.numpy as jnp
from jax.experimental import pallas as pl
from jax.experimental.pallas import tpu as pltpu


def _round_up(x, m):
    return ((x + m - 1) // m) * m


def _linear_kernel(x_ref, w_ref, b_ref, o_ref):
    """One (i, j, k) grid step of y = x @ W + b.

    x_ref: (tm, tk)  bf16
    w_ref: (tk, tn)  bf16  (weight pre-transposed to (K, N) in the wrapper)
    b_ref: (1,  tn)  f32
    o_ref: (tm, tn)  f32   -- resident across the K axis (same (i, j) block),
                              used directly as the f32 accumulator.
    """
    k = pl.program_id(2)

    # Fold the bias into the accumulator init (removes the epilogue add).
    @pl.when(k == 0)
    def _():
        o_ref[...] = jnp.broadcast_to(b_ref[...], o_ref.shape)

    # bf16 x bf16 -> f32 accumulate on the MXU.
    o_ref[...] += jnp.dot(
        x_ref[...], w_ref[...], preferred_element_type=jnp.float32
    )


@functools.partial(jax.jit, static_argnames=("tm", "tn", "tk"))
def linear_pallas(x, weight, bias=None, *, tm=512, tn=512, tk=1024):
    """y = x @ weight.T + bias   (PyTorch nn.Linear forward).

    x:      (..., K) f32
    weight: (N, K)   f32  -- PyTorch nn.Linear (out, in) layout
    bias:   (N,)     f32 or None
    """
    orig_shape = x.shape
    K = orig_shape[-1]
    x2 = x.reshape(-1, K)
    M = x2.shape[0]
    N, K2 = weight.shape
    assert K == K2, (K, K2)
    if bias is None:
        bias = jnp.zeros((N,), jnp.float32)

    # Clamp tiles to the (padded) problem size; keep (8, 128) alignment and a
    # lane-dense (>=128) output tile.
    tm_ = min(tm, _round_up(M, 8))
    tn_ = min(tn, _round_up(N, 128))
    tk_ = min(tk, _round_up(K, 128))

    Mp = _round_up(M, tm_)
    Np = _round_up(N, tn_)
    Kp = _round_up(K, tk_)

    # v7x has 2 TensorCores: keep >= 2 parallel (i, j) blocks when the problem
    # is large enough so "parallel" grid axes can actually shard across them.
    if (Mp // tm_) * (Np // tn_) < 2:
        if tn_ >= 256 and Np >= 256:
            tn_ = _round_up(tn_ // 2, 128)
            Np = _round_up(N, tn_)
        elif tm_ >= 16 and Mp >= 16:
            tm_ = _round_up(tm_ // 2, 8)
            Mp = _round_up(M, tm_)

    # Pad (K padding is required for a correct reduction) and cast to bf16.
    xp = x2
    if (Mp, Kp) != (M, K):
        xp = jnp.pad(xp, ((0, Mp - M), (0, Kp - K)))
    xp = xp.astype(jnp.bfloat16)

    # One-time transpose of the static weight to (K, N): the kernel then runs
    # the canonical (tm,tk) x (tk,tn) matmul with no per-step transpose.
    wt = weight.T
    if (Kp, Np) != (K, N):
        wt = jnp.pad(wt, ((0, Kp - K), (0, Np - N)))
    wt = wt.astype(jnp.bfloat16)

    bp = bias.astype(jnp.float32).reshape(1, N)
    if Np != N:
        bp = jnp.pad(bp, ((0, 0), (0, Np - N)))

    grid = (Mp // tm_, Np // tn_, Kp // tk_)

    cost = pl.CostEstimate(
        flops=2 * M * N * K,
        transcendentals=0,
        bytes_accessed=2 * (M * K + K * N) + 4 * (M * N + N),
    )

    # TODO(synk): if profiling shows exposed input DMA after the bf16 switch,
    # bump the x / W in_specs to pipeline_mode=pl.Buffered(3).
    out = pl.pallas_call(
        _linear_kernel,
        out_shape=jax.ShapeDtypeStruct((Mp, Np), jnp.float32),
        grid_spec=pltpu.PrefetchScalarGridSpec(
            num_scalar_prefetch=0,
            grid=grid,
            in_specs=[
                pl.BlockSpec((tm_, tk_), lambda i, j, k: (i, k)),  # x tile
                pl.BlockSpec((tk_, tn_), lambda i, j, k: (k, j)),  # W^T tile
                pl.BlockSpec((1, tn_), lambda i, j, k: (0, j)),    # bias tile
            ],
            out_specs=pl.BlockSpec((tm_, tn_), lambda i, j, k: (i, j)),
        ),
        compiler_params=pltpu.CompilerParams(
            dimension_semantics=("parallel", "parallel", "arbitrary"),
            vmem_limit_bytes=48 * 1024 * 1024,
        ),
        cost_estimate=cost,
    )(xp, wt, bp)

    if (Mp, Np) != (M, N):
        out = out[:M, :N]
    return out.reshape(orig_shape[:-1] + (N,))


if __name__ == "__main__":
    key = jax.random.PRNGKey(0)
    k_x, k_w, k_b = jax.random.split(key, 3)

    batch, in_size, out_size = 256, 512, 512

    # Xavier-normal weight (matches torch.nn.init.xavier_normal_), PyTorch
    # (out, in) layout; bias uses nn.Linear's default U(-1/sqrt(in), 1/sqrt(in)).
    std = (2.0 / (in_size + out_size)) ** 0.5
    weight = std * jax.random.normal(k_w, (out_size, in_size), jnp.float32)
    bound = 1.0 / (in_size ** 0.5)
    bias = jax.random.uniform(k_b, (out_size,), jnp.float32, -bound, bound)
    x = jax.random.normal(k_x, (batch, in_size), jnp.float32)

    # Reference with the same bf16 operand rounding / f32 accumulation.
    def ref_bf16(x_, w_, b_):
        return jnp.dot(
            x_.astype(jnp.bfloat16),
            w_.T.astype(jnp.bfloat16),
            preferred_element_type=jnp.float32,
        ) + b_

    # 1) Default (large) tiles.
    y = linear_pallas(x, weight, bias)
    jax.block_until_ready(y)
    y_ref = ref_bf16(x, weight, bias)
    assert y.shape == (batch, out_size)
    assert jnp.allclose(y, y_ref, atol=1e-2, rtol=1e-2), float(
        jnp.max(jnp.abs(y - y_ref)))

    # Loose sanity check against the full-precision reference.
    y_f32 = jnp.dot(x, weight.T, precision=jax.lax.Precision.HIGHEST) + bias
    assert jnp.allclose(y, y_f32, atol=5e-2, rtol=5e-2), float(
        jnp.max(jnp.abs(y - y_f32)))

    # 2) Small explicit tiles -> full (2, 2, 2) grid with K accumulation into
    #    the resident f32 output block.
    y_t = linear_pallas(x, weight, bias, tm=128, tn=256, tk=256)
    jax.block_until_ready(y_t)
    assert jnp.allclose(y_t, y_ref, atol=1e-2, rtol=1e-2), float(
        jnp.max(jnp.abs(y_t - y_ref)))

    # 3) Tiny, non-tile-aligned shape (exercises the padding/clamping path).
    b2, i2, o2 = 8, 32, 64
    std2 = (2.0 / (i2 + o2)) ** 0.5
    w2 = std2 * jax.random.normal(k_w, (o2, i2), jnp.float32)
    bias2 = jax.random.uniform(k_b, (o2,), jnp.float32, -1.0, 1.0) / (i2 ** 0.5)
    x2 = jax.random.normal(k_x, (b2, i2), jnp.float32)
    y2 = linear_pallas(x2, w2, bias2)
    jax.block_until_ready(y2)
    assert jnp.allclose(y2, ref_bf16(x2, w2, bias2), atol=1e-2, rtol=1e-2)

    print("KERNEL_OK")
</pallas_src>

<mosaic_0001>
module attributes {stable_mosaic.version = 11 : i64} {
  func.func @_linear_kernel(%arg0: i32, %arg1: i32, %arg2: i32, %arg3: memref<256x512xbf16, #tpu.memory_space<vmem>>, %arg4: memref<512x256xbf16, #tpu.memory_space<vmem>>, %arg5: memref<1x256xf32, #tpu.memory_space<vmem>>, %arg6: memref<256x256xf32, #tpu.memory_space<vmem>>) attributes {dimension_semantics = [#tpu.dimension_semantics<parallel>, #tpu.dimension_semantics<parallel>, #tpu.dimension_semantics<arbitrary>], iteration_bounds = array<i64: 1, 2, 1>, scalar_prefetch = 0 : i64, scratch_operands = 0 : i64, tpu.core_type = #tpu.core_type<tc>, window_params = [{transform_indices = @transform_0, window_bounds = array<i64: 256, 512>}, {transform_indices = @transform_1, window_bounds = array<i64: 512, 256>}, {transform_indices = @transform_2, window_bounds = array<i64: 1, 256>}, {transform_indices = @transform_3, window_bounds = array<i64: 256, 256>}]} {
    %c0_i32 = arith.constant 0 : i32
    %0 = arith.cmpi eq, %arg2, %c0_i32 : i32
    %1 = arith.extui %0 : i1 to i32
    %c0_i32_0 = arith.constant 0 : i32
    %2 = arith.cmpi ne, %1, %c0_i32_0 : i32
    scf.if %2 {
      %c0_8 = arith.constant 0 : index
      %c0_9 = arith.constant 0 : index
      %9 = vector.load %arg5[%c0_8, %c0_9] : memref<1x256xf32, #tpu.memory_space<vmem>>, vector<1x256xf32>
      %10 = vector.shape_cast %9 : vector<1x256xf32> to vector<1x256xf32>
      %11 = vector.broadcast %10 : vector<1x256xf32> to vector<256x256xf32>
      %c0_10 = arith.constant 0 : index
      %c0_11 = arith.constant 0 : index
      %12 = vector.load %arg6[%c0_10, %c0_11] : memref<256x256xf32, #tpu.memory_space<vmem>>, vector<256x256xf32>
      tpu.vector_store %arg6[%c0_10, %c0_11], %11 {strides = array<i32>} : memref<256x256xf32, #tpu.memory_space<vmem>>, vector<256x256xf32>,
    } else {
    }
    %c0 = arith.constant 0 : index
    %c0_1 = arith.constant 0 : index
    %3 = vector.load %arg6[%c0, %c0_1] : memref<256x256xf32, #tpu.memory_space<vmem>>, vector<256x256xf32>
    %c0_2 = arith.constant 0 : index
    %c0_3 = arith.constant 0 : index
    %4 = vector.load %arg3[%c0_2, %c0_3] : memref<256x512xbf16, #tpu.memory_space<vmem>>, vector<256x512xbf16>
    %c0_4 = arith.constant 0 : index
    %c0_5 = arith.constant 0 : index
    %5 = vector.load %arg4[%c0_4, %c0_5] : memref<512x256xbf16, #tpu.memory_space<vmem>>, vector<512x256xbf16>
    %cst = arith.constant dense<0.000000e+00> : vector<256x256xf32>
    %6 = tpu.matmul %4, %5, %cst {dimension_numbers = #tpu.dot_dimension_numbers<[1], [0], [0], [1], [0, 0, 1, 1], [], []>} : vector<256x512xbf16>, vector<512x256xbf16>, vector<256x256xf32> -> vector<256x256xf32>
    %7 = arith.addf %3, %6 : vector<256x256xf32>
    %c0_6 = arith.constant 0 : index
    %c0_7 = arith.constant 0 : index
    %8 = vector.load %arg6[%c0_6, %c0_7] : memref<256x256xf32, #tpu.memory_space<vmem>>, vector<256x256xf32>
    tpu.vector_store %arg6[%c0_6, %c0_7], %7 {strides = array<i32>} : memref<256x256xf32, #tpu.memory_space<vmem>>, vector<256x256xf32>,
    return
  }
  func.func @transform_0(%arg0: i32, %arg1: i32, %arg2: i32) -> (i32, i32) {
    %c0_i32 = arith.constant 0 : i32
    return %arg0, %arg2 : i32, i32
  }
  func.func @transform_1(%arg0: i32, %arg1: i32, %arg2: i32) -> (i32, i32) {
    %c0_i32 = arith.constant 0 : i32
    return %arg2, %arg1 : i32, i32
  }
  func.func @transform_2(%arg0: i32, %arg1: i32, %arg2: i32) -> (i32, i32) {
    %c0_i32 = arith.constant 0 : i32
    %c0_i32_0 = arith.constant 0 : i32
    return %c0_i32, %arg1 : i32, i32
  }
  func.func @transform_3(%arg0: i32, %arg1: i32, %arg2: i32) -> (i32, i32) {
    %c0_i32 = arith.constant 0 : i32
    return %arg0, %arg1 : i32, i32
  }
}

</mosaic_0001>

<bundles_post_ra>
// kernel: linear_pallas.1
= control target key start
LH: loop header
LB: loop body
LE: loop exit
PB: predicated region body
PF: predicated region fallthrough
CT: control target
= control target key end

     0   :  { %8 = vsyncpa [#allocation4], 0  ;;  %s3326_s0 = inlined_call_operand.vmem [shape: bf16[256,512], index: 0, kind: input, shape index: {}]   ;;  %s3327_s1 = inlined_call_operand.vmem [shape: bf16[512,512], index: 1, kind: input, shape index: {}]   ;;  %s3328_s2 = inlined_call_operand.vmem [shape: f32[1,512], index: 2, kind: input, shape index: {}]   ;;  %s3329_s3 = inlined_call_operand.hbm [shape: f32[256,512], index: 3, kind: output, shape index: {}]  }
   0x1   :  { %10 = vsyncpa [#allocation4 + $0x1], 0  ;;  %s2669_s12 = smov 0   ;;  %s2671_s13 = smov 0  }
   0x2   :  { %s2673_s14 = smov 0   ;;  %s2675_s15 = smov 0  }
   0x3   :  { %s2677_s16 = smov 0   ;;  %s2679_s17 = smov 0  }
   0x4 LB: > { %s2104_s18 = sadd.s32 4294967295, %s2643_s17   ;;  %s2105_s19 = sadd.s32 4294967294, %s2643_s17   ;;  %s2643_s17 = sphi %s2679_s17, %s16_s17   ;;  %s2639_s16 = sphi %s2677_s16, %s3336_s16   ;;  %s2635_s15 = sphi %s2675_s15, %s3335_s15   ;;  %s2631_s14 = sphi %s2673_s14, %s3334_s14   ;;  %s2627_s13 = sphi %s2671_s13, %s3333_s13   ;;  %s2623_s12 = sphi %s2669_s12, %s3332_s12  }
   0x5   : > { %s31_s20 = sadd.s32 1, %s2639_s16  ;;  %s72_s21 = sadd.s32 1, %s2631_s14 }
   0x6   : > { %p33_p0 = scmp.ge.s32.totalorder %s31_s20, 2  ;;  %p79_p1 = scmp.ne.s32.totalorder %s2631_s14, %s2627_s13 }
   0x7   : > { %p80_p2 = scmp.eq.s32.totalorder %s2643_s17, 0  ;;  %p137_p3 = scmp.eq.s32.totalorder %s2104_s18, 1 }
   0x8   : > { %s3338_s20 = smov (%p33_p0, %s31_s20), 0  ;;  %p142_p6 = scmp.ne.s32.totalorder %s2627_s13, %s2623_s12 }
   0x9   : > { %p81_p4 = por %p80_p2, %p79_p1  ;;  %p2708_p5 = por %p137_p3, %p79_p1 }
   0xa   : > { %s68_s23 = ssub.s32 %s2639_s16, %s3338_s20  ;;  %p143_p8 = scmp.eq.s32.totalorder %s2105_s19, 1 }
   0xb   : > { %p70_p7 = scmp.eq.s32.totalorder %s68_s23, 0  ;;  %p2108_p10 = scmp.ge.s32.totalorder %s2643_s17, 2 }
   0xc   : > { %p2719_p9 = por %p143_p8, %p142_p6 }
   0xd   : > { %s2717_s24 = scalar_select %p70_p7, %s2631_s14, %s72_s21  }
   0xe   : > { %174 = sbr.rel (%p2108_p10) target bundleno = 57 (0x39), region = 20 }
  0x15   : > { %177 = sbr.rel (!%p81_p4) target bundleno = 57 (0x39), region = 24  ;;  %s179_s26 = sand.u32 (%p81_p4), 1, %s2631_s14  }
  0x16   : > { %s2249_s27 = sshll.u32 (%p81_p4), %s2639_s16, 3  ;;  %s2109_s28 = sshll.u32 (%p81_p4), %s179_s26, 9 }
  0x17   : > { %s2731_s4 = scalar_lea.vmem (%p81_p4), %s3327_s1, %s2249_s27  ;;  %s2736_s5 = scalar_lea.vmem (%p81_p4), [#allocation2], %s2109_s28 }
  0x18   : > { %v341_v0 = vld [vmem:[%s2731_s4] sm:$0xff] (%p81_p4)  ;;  %v343_v1 = vld [vmem:[%s2731_s4 + $0x10] sm:$0xff] (%p81_p4) }
  0x19   : > { %v345_v2 = vld [vmem:[%s2731_s4 + $0x20] sm:$0xff] (%p81_p4)  ;;  %342 = vst [vmem:[%s2736_s5] sm:$0xff] (%p81_p4), %v341_v0  ;;  %344 = vst [vmem:[%s2736_s5 + $0x8] sm:$0xff] (%p81_p4), %v343_v1  ;;  %v347_v3 = vld [vmem:[%s2731_s4 + $0x30] sm:$0xff] (%p81_p4) }
  0x1a   : > { %346 = vst [vmem:[%s2736_s5 + $0x10] sm:$0xff] (%p81_p4), %v345_v2  ;;  %v349_v4 = vld [vmem:[%s2731_s4 + $0x40] sm:$0xff] (%p81_p4)  ;;  %v351_v5 = vld [vmem:[%s2731_s4 + $0x50] sm:$0xff] (%p81_p4)  ;;  %348 = vst [vmem:[%s2736_s5 + $0x18] sm:$0xff] (%p81_p4), %v347_v3 }
  0x1b   : > { %350 = vst [vmem:[%s2736_s5 + $0x20] sm:$0xff] (%p81_p4), %v349_v4  ;;  %352 = vst [vmem:[%s2736_s5 + $0x28] sm:$0xff] (%p81_p4), %v351_v5  ;;  %v353_v6 = vld [vmem:[%s2731_s4 + $0x60] sm:$0xff] (%p81_p4)  ;;  %v355_v7 = vld [vmem:[%s2731_s4 + $0x70] sm:$0xff] (%p81_p4) }
  0x1c   : > { %v357_v8 = vld [vmem:[%s2731_s4 + $0x80] sm:$0xff]  ;;  %354 = vst [vmem:[%s2736_s5 + $0x30] sm:$0xff] %v353_v6  ;;  %356 = vst [vmem:[%s2736_s5 + $0x38] sm:$0xff] %v355_v7  ;;  %v359_v9 = vld [vmem:[%s2731_s4 + $0x90] sm:$0xff] }
  0x1d   : > { %358 = vst [vmem:[%s2736_s5 + $0x40] sm:$0xff] %v357_v8  ;;  %v361_v10 = vld [vmem:[%s2731_s4 + $0xa0] sm:$0xff]  ;;  %v363_v11 = vld [vmem:[%s2731_s4 + $0xb0] sm:$0xff]  ;;  %360 = vst [vmem:[%s2736_s5 + $0x48] sm:$0xff] %v359_v9 }
  0x1e   : > { %362 = vst [vmem:[%s2736_s5 + $0x50] sm:$0xff] %v361_v10  ;;  %364 = vst [vmem:[%s2736_s5 + $0x58] sm:$0xff] %v363_v11  ;;  %v365_v12 = vld [vmem:[%s2731_s4 + $0xc0] sm:$0xff]  ;;  %v367_v13 = vld [vmem:[%s2731_s4 + $0xd0] sm:$0xff] }
  0x1f   : > { %v369_v14 = vld [vmem:[%s2731_s4 + $0xe0] sm:$0xff]  ;;  %366 = vst [vmem:[%s2736_s5 + $0x60] sm:$0xff] %v365_v12  ;;  %368 = vst [vmem:[%s2736_s5 + $0x68] sm:$0xff] %v367_v13  ;;  %v371_v15 = vld [vmem:[%s2731_s4 + $0xf0] sm:$0xff] }
  0x20   : > { %370 = vst [vmem:[%s2736_s5 + $0x70] sm:$0xff] %v369_v14  ;;  %v373_v16 = vld [vmem:[%s2731_s4 + $0x100] sm:$0xff]  ;;  %v375_v17 = vld [vmem:[%s2731_s4 + $0x110] sm:$0xff]  ;;  %372 = vst [vmem:[%s2736_s5 + $0x78] sm:$0xff] %v371_v15 }
  0x21   : > { %374 = vst [vmem:[%s2736_s5 + $0x80] sm:$0xff] %v373_v16  ;;  %376 = vst [vmem:[%s2736_s5 + $0x88] sm:$0xff] %v375_v17  ;;  %v377_v18 = vld [vmem:[%s2731_s4 + $0x120] sm:$0xff]  ;;  %v379_v19 = vld [vmem:[%s2731_s4 + $0x130] sm:$0xff] }
  0x22   : > { %v381_v20 = vld [vmem:[%s2731_s4 + $0x140] sm:$0xff]  ;;  %378 = vst [vmem:[%s2736_s5 + $0x90] sm:$0xff] %v377_v18  ;;  %380 = vst [vmem:[%s2736_s5 + $0x98] sm:$0xff] %v379_v19  ;;  %v383_v21 = vld [vmem:[%s2731_s4 + $0x150] sm:$0xff] }
  0x23   : > { %382 = vst [vmem:[%s2736_s5 + $0xa0] sm:$0xff] %v381_v20  ;;  %v385_v22 = vld [vmem:[%s2731_s4 + $0x160] sm:$0xff]  ;;  %v387_v23 = vld [vmem:[%s2731_s4 + $0x170] sm:$0xff]  ;;  %384 = vst [vmem:[%s2736_s5 + $0xa8] sm:$0xff] %v383_v21 }
  0x24   : > { %386 = vst [vmem:[%s2736_s5 + $0xb0] sm:$0xff] %v385_v22  ;;  %388 = vst [vmem:[%s2736_s5 + $0xb8] sm:$0xff] %v387_v23  ;;  %v389_v24 = vld [vmem:[%s2731_s4 + $0x180] sm:$0xff]  ;;  %v391_v25 = vld [vmem:[%s2731_s4 + $0x190] sm:$0xff] }
  0x25   : > { %v393_v26 = vld [vmem:[%s2731_s4 + $0x1a0] sm:$0xff]  ;;  %390 = vst [vmem:[%s2736_s5 + $0xc0] sm:$0xff] %v389_v24  ;;  %392 = vst [vmem:[%s2736_s5 + $0xc8] sm:$0xff] %v391_v25  ;;  %v395_v27 = vld [vmem:[%s2731_s4 + $0x1b0] sm:$0xff] }
  0x26   : > { %394 = vst [vmem:[%s2736_s5 + $0xd0] sm:$0xff] %v393_v26  ;;  %v397_v28 = vld [vmem:[%s2731_s4 + $0x1c0] sm:$0xff]  ;;  %v399_v29 = vld [vmem:[%s2731_s4 + $0x1d0] sm:$0xff]  ;;  %396 = vst [vmem:[%s2736_s5 + $0xd8] sm:$0xff] %v395_v27 }
  0x27   : > { %398 = vst [vmem:[%s2736_s5 + $0xe0] sm:$0xff] %v397_v28  ;;  %400 = vst [vmem:[%s2736_s5 + $0xe8] sm:$0xff] %v399_v29  ;;  %v401_v30 = vld [vmem:[%s2731_s4 + $0x1e0] sm:$0xff]  ;;  %v403_v31 = vld [vmem:[%s2731_s4 + $0x1f0] sm:$0xff] }
  0x28   : > { %v405_v32 = vld [vmem:[%s2731_s4 + $0x200] sm:$0xff]  ;;  %402 = vst [vmem:[%s2736_s5 + $0xf0] sm:$0xff] %v401_v30  ;;  %404 = vst [vmem:[%s2736_s5 + $0xf8] sm:$0xff] %v403_v31  ;;  %v407_v33 = vld [vmem:[%s2731_s4 + $0x210] sm:$0xff] }
  0x29   : > { %406 = vst [vmem:[%s2736_s5 + $0x100] sm:$0xff] %v405_v32  ;;  %v409_v34 = vld [vmem:[%s2731_s4 + $0x220] sm:$0xff]  ;;  %v411_v35 = vld [vmem:[%s2731_s4 + $0x230] sm:$0xff]  ;;  %408 = vst [vmem:[%s2736_s5 + $0x108] sm:$0xff] %v407_v33 }
  0x2a   : > { %410 = vst [vmem:[%s2736_s5 + $0x110] sm:$0xff] %v409_v34  ;;  %412 = vst [vmem:[%s2736_s5 + $0x118] sm:$0xff] %v411_v35  ;;  %v413_v36 = vld [vmem:[%s2731_s4 + $0x240] sm:$0xff]  ;;  %v415_v37 = vld [vmem:[%s2731_s4 + $0x250] sm:$0xff] }
  0x2b   : > { %v417_v38 = vld [vmem:[%s2731_s4 + $0x260] sm:$0xff]  ;;  %414 = vst [vmem:[%s2736_s5 + $0x120] sm:$0xff] %v413_v36  ;;  %416 = vst [vmem:[%s2736_s5 + $0x128] sm:$0xff] %v415_v37  ;;  %v419_v39 = vld [vmem:[%s2731_s4 + $0x270] sm:$0xff] }
  0x2c   : > { %418 = vst [vmem:[%s2736_s5 + $0x130] sm:$0xff] %v417_v38  ;;  %v421_v40 = vld [vmem:[%s2731_s4 + $0x280] sm:$0xff]  ;;  %v423_v41 = vld [vmem:[%s2731_s4 + $0x290] sm:$0xff]  ;;  %420 = vst [vmem:[%s2736_s5 + $0x138] sm:$0xff] %v419_v39 }
  0x2d   : > { %422 = vst [vmem:[%s2736_s5 + $0x140] sm:$0xff] %v421_v40  ;;  %424 = vst [vmem:[%s2736_s5 + $0x148] sm:$0xff] %v423_v41  ;;  %v425_v42 = vld [vmem:[%s2731_s4 + $0x2a0] sm:$0xff]  ;;  %v427_v43 = vld [vmem:[%s2731_s4 + $0x2b0] sm:$0xff] }
  0x2e   : > { %v429_v44 = vld [vmem:[%s2731_s4 + $0x2c0] sm:$0xff]  ;;  %426 = vst [vmem:[%s2736_s5 + $0x150] sm:$0xff] %v425_v42  ;;  %428 = vst [vmem:[%s2736_s5 + $0x158] sm:$0xff] %v427_v43  ;;  %v431_v45 = vld [vmem:[%s2731_s4 + $0x2d0] sm:$0xff] }
  0x2f   : > { %430 = vst [vmem:[%s2736_s5 + $0x160] sm:$0xff] %v429_v44  ;;  %v433_v46 = vld [vmem:[%s2731_s4 + $0x2e0] sm:$0xff]  ;;  %v435_v47 = vld [vmem:[%s2731_s4 + $0x2f0] sm:$0xff]  ;;  %432 = vst [vmem:[%s2736_s5 + $0x168] sm:$0xff] %v431_v45 }
  0x30   : > { %434 = vst [vmem:[%s2736_s5 + $0x170] sm:$0xff] %v433_v46  ;;  %436 = vst [vmem:[%s2736_s5 + $0x178] sm:$0xff] %v435_v47  ;;  %v437_v48 = vld [vmem:[%s2731_s4 + $0x300] sm:$0xff]  ;;  %v439_v49 = vld [vmem:[%s2731_s4 + $0x310] sm:$0xff] }
  0x31   : > { %v441_v50 = vld [vmem:[%s2731_s4 + $0x320] sm:$0xff]  ;;  %438 = vst [vmem:[%s2736_s5 + $0x180] sm:$0xff] %v437_v48  ;;  %440 = vst [vmem:[%s2736_s5 + $0x188] sm:$0xff] %v439_v49  ;;  %v443_v51 = vld [vmem:[%s2731_s4 + $0x330] sm:$0xff] }
  0x32   : > { %442 = vst [vmem:[%s2736_s5 + $0x190] sm:$0xff] %v441_v50  ;;  %v445_v52 = vld [vmem:[%s2731_s4 + $0x340] sm:$0xff]  ;;  %v447_v53 = vld [vmem:[%s2731_s4 + $0x350] sm:$0xff]  ;;  %444 = vst [vmem:[%s2736_s5 + $0x198] sm:$0xff] %v443_v51 }
  0x33   : > { %446 = vst [vmem:[%s2736_s5 + $0x1a0] sm:$0xff] %v445_v52  ;;  %448 = vst [vmem:[%s2736_s5 + $0x1a8] sm:$0xff] %v447_v53  ;;  %v449_v54 = vld [vmem:[%s2731_s4 + $0x360] sm:$0xff]  ;;  %v451_v55 = vld [vmem:[%s2731_s4 + $0x370] sm:$0xff] }
  0x34   : > { %v453_v56 = vld [vmem:[%s2731_s4 + $0x380] sm:$0xff]  ;;  %450 = vst [vmem:[%s2736_s5 + $0x1b0] sm:$0xff] %v449_v54  ;;  %452 = vst [vmem:[%s2736_s5 + $0x1b8] sm:$0xff] %v451_v55  ;;  %v455_v57 = vld [vmem:[%s2731_s4 + $0x390] sm:$0xff] }
  0x35   : > { %454 = vst [vmem:[%s2736_s5 + $0x1c0] sm:$0xff] %v453_v56  ;;  %v457_v58 = vld [vmem:[%s2731_s4 + $0x3a0] sm:$0xff]  ;;  %v459_v59 = vld [vmem:[%s2731_s4 + $0x3b0] sm:$0xff]  ;;  %456 = vst [vmem:[%s2736_s5 + $0x1c8] sm:$0xff] %v455_v57 }
  0x36   : > { %458 = vst [vmem:[%s2736_s5 + $0x1d0] sm:$0xff] %v457_v58  ;;  %460 = vst [vmem:[%s2736_s5 + $0x1d8] sm:$0xff] %v459_v59  ;;  %v461_v60 = vld [vmem:[%s2731_s4 + $0x3c0] sm:$0xff]  ;;  %v463_v61 = vld [vmem:[%s2731_s4 + $0x3d0] sm:$0xff] }
  0x37   : > { %v465_v62 = vld [vmem:[%s2731_s4 + $0x3e0] sm:$0xff]  ;;  %462 = vst [vmem:[%s2736_s5 + $0x1e0] sm:$0xff] %v461_v60  ;;  %464 = vst [vmem:[%s2736_s5 + $0x1e8] sm:$0xff] %v463_v61  ;;  %v467_v63 = vld [vmem:[%s2731_s4 + $0x3f0] sm:$0xff] }
  0x38   : > { %466 = vst [vmem:[%s2736_s5 + $0x1f0] sm:$0xff] %v465_v62  ;;  %468 = vst [vmem:[%s2736_s5 + $0x1f8] sm:$0xff] %v467_v63 }
  0x39 PF: > { %p2112_p11 = scmp.ge.s32.totalorder %s2643_s17, 1  ;;  %p481_p12 = scmp.lt.s32.totalorder %s2643_s17, 3 }
  0x3b   : > { %p482_p13 = pnand %p2112_p11, %p481_p12 }
  0x3c   : > { %s488_s6 = sand.u32 (!%p482_p13), 1, %s2627_s13   ;;  %v2471_v0 = vld [vmem:[%s3326_s0 + $0x4] ss:$16 sps:$4 sm:$0xff] (!%p482_p13)   ;;  %v2474_v1 = vld [vmem:[%s3326_s0 + $0xc] ss:$16 sps:$4 sm:$0xff] (!%p482_p13)   ;;  %s2115_s27 = sshll.u32 (!%p482_p13), %s2635_s15, 1 }
  0x3d   : > { %485 = sbr.rel (%p482_p13) target bundleno = 484 (0x1e4), region = 66  ;;  %s2868_s7 = sshll.u32 (!%p482_p13), %s488_s6, 9  ;;  %1490 = vmatprep.mubr.bf16.mxu1 (!%p482_p13), %v2471_v0  ;;  %1683 = vmatprep.mubr.bf16.mxu0 (!%p482_p13), %v2474_v1 }
  0x3e   : > { %s2877_s18 = scalar_lea.vmem (!%p482_p13), [#allocation2], %s2868_s7  ;;  %p540_p0 = scmp.lt.s32.totalorder (!%p482_p13), %s2115_s27, 3 }
  0x3f   : > { %v2373_v2 = vld [vmem:[%s2877_s18 + $0x4] ss:$8 sps:$4 sm:$0xff] (!%p482_p13)   ;;  %v2377_v4 = vld [vmem:[%s2877_s18] ss:$8 sps:$4 sm:$0xff] (!%p482_p13)   ;;  %v2379_v6 = vld [vmem:[%s2877_s18 + $0x14] ss:$8 sps:$4 sm:$0xff] (!%p482_p13)  }
  0x40   : > { %v2375_v3 = vld [vmem:[%s2877_s18 + $0x104] ss:$8 sps:$4 sm:$0xff] (!%p482_p13)   ;;  %1458 = vmatprep.subr.bf16.mxu1 (!%p482_p13), %v2373_v2  ;;  %v2378_v5 = vld [vmem:[%s2877_s18 + $0x100] ss:$8 sps:$4 sm:$0xff] (!%p482_p13)   ;;  %v2381_v7 = vld [vmem:[%s2877_s18 + $0x114] ss:$8 sps:$4 sm:$0xff] (!%p482_p13)  }
  0x41   : > { %1651 = vmatprep.subr.bf16.mxu0 (!%p482_p13), %v2375_v3  ;;  %1459 = vmatpush1.bf16.msra.mxu1 (!%p482_p13), %v2377_v4  ;;  %v2383_v8 = vld [vmem:[%s2877_s18 + $0x10] ss:$8 sps:$4 sm:$0xff] (!%p482_p13)   ;;  %v2385_v10 = vld [vmem:[%s2877_s18 + $0x24] ss:$8 sps:$4 sm:$0xff] (!%p482_p13)   ;;  %v2389_v12 = vld [vmem:[%s2877_s18 + $0x20] ss:$8 sps:$4 sm:$0xff] (!%p482_p13)  }
  0x42   : > { %1652 = vmatpush1.bf16.msra.mxu0 (!%p482_p13), %v2378_v5  ;;  %1460 = vmatprep.subr.bf16.mxu1 (!%p482_p13), %v2379_v6  ;;  %v2384_v9 = vld [vmem:[%s2877_s18 + $0x110] ss:$8 sps:$4 sm:$0xff] (!%p482_p13)   ;;  %v2387_v11 = vld [vmem:[%s2877_s18 + $0x124] ss:$8 sps:$4 sm:$0xff] (!%p482_p13)   ;;  %v2390_v13 = vld [vmem:[%s2877_s18 + $0x120] ss:$8 sps:$4 sm:$0xff] (!%p482_p13)  }
  0x43   : > { %1653 = vmatprep.subr.bf16.mxu0 (!%p482_p13), %v2381_v7  ;;  %v2391_v14 = vld [vmem:[%s2877_s18 + $0x34] ss:$8 sps:$4 sm:$0xff] (!%p482_p13)   ;;  %v2395_v16 = vld [vmem:[%s2877_s18 + $0x30] ss:$8 sps:$4 sm:$0xff] (!%p482_p13)   ;;  %v2397_v18 = vld [vmem:[%s2877_s18 + $0x44] ss:$8 sps:$4 sm:$0xff] (!%p482_p13)  }
  0x44   : > { %v2393_v15 = vld [vmem:[%s2877_s18 + $0x134] ss:$8 sps:$4 sm:$0xff]   ;;  %v2396_v17 = vld [vmem:[%s2877_s18 + $0x130] ss:$8 sps:$4 sm:$0xff]   ;;  %v2399_v19 = vld [vmem:[%s2877_s18 + $0x144] ss:$8 sps:$4 sm:$0xff]  }
  0x45   : > { %1461 = vmatpush1.bf16.msra.mxu1 %v2383_v8  ;;  %v2401_v20 = vld [vmem:[%s2877_s18 + $0x40] ss:$8 sps:$4 sm:$0xff]   ;;  %v2403_v22 = vld [vmem:[%s2877_s18 + $0x54] ss:$8 sps:$4 sm:$0xff]   ;;  %v2407_v24 = vld [vmem:[%s2877_s18 + $0x50] ss:$8 sps:$4 sm:$0xff]  }
  0x46   : > { %1654 = vmatpush1.bf16.msra.mxu0 %v2384_v9  ;;  %1462 = vmatprep.subr.bf16.mxu1 %v2385_v10  ;;  %v2402_v21 = vld [vmem:[%s2877_s18 + $0x140] ss:$8 sps:$4 sm:$0xff]   ;;  %v2405_v23 = vld [vmem:[%s2877_s18 + $0x154] ss:$8 sps:$4 sm:$0xff]   ;;  %v2408_v25 = vld [vmem:[%s2877_s18 + $0x150] ss:$8 sps:$4 sm:$0xff]  }
  0x47   : > { %1655 = vmatprep.subr.bf16.mxu0 %v2387_v11  ;;  %v2409_v26 = vld [vmem:[%s2877_s18 + $0x64] ss:$8 sps:$4 sm:$0xff]   ;;  %v2413_v28 = vld [vmem:[%s2877_s18 + $0x60] ss:$8 sps:$4 sm:$0xff]   ;;  %v2415_v30 = vld [vmem:[%s2877_s18 + $0x74] ss:$8 sps:$4 sm:$0xff]  }
  0x48   : > { %v2411_v27 = vld [vmem:[%s2877_s18 + $0x164] ss:$8 sps:$4 sm:$0xff]   ;;  %v2414_v29 = vld [vmem:[%s2877_s18 + $0x160] ss:$8 sps:$4 sm:$0xff]   ;;  %v2417_v31 = vld [vmem:[%s2877_s18 + $0x174] ss:$8 sps:$4 sm:$0xff]  }
  0x49   : > { %1463 = vmatpush1.bf16.msra.mxu1 %v2389_v12  ;;  %v2419_v32 = vld [vmem:[%s2877_s18 + $0x70] ss:$8 sps:$4 sm:$0xff]   ;;  %v2421_v34 = vld [vmem:[%s2877_s18 + $0x84] ss:$8 sps:$4 sm:$0xff]   ;;  %v2425_v36 = vld [vmem:[%s2877_s18 + $0x80] ss:$8 sps:$4 sm:$0xff]  }
  0x4a   : > { %1656 = vmatpush1.bf16.msra.mxu0 %v2390_v13  ;;  %1464 = vmatprep.subr.bf16.mxu1 %v2391_v14  ;;  %v2420_v33 = vld [vmem:[%s2877_s18 + $0x170] ss:$8 sps:$4 sm:$0xff]   ;;  %v2423_v35 = vld [vmem:[%s2877_s18 + $0x184] ss:$8 sps:$4 sm:$0xff]   ;;  %v2426_v37 = vld [vmem:[%s2877_s18 + $0x180] ss:$8 sps:$4 sm:$0xff]  }
  0x4b   : > { %1657 = vmatprep.subr.bf16.mxu0 %v2393_v15  ;;  %v2427_v38 = vld [vmem:[%s2877_s18 + $0x94] ss:$8 sps:$4 sm:$0xff]   ;;  %v2431_v40 = vld [vmem:[%s2877_s18 + $0x90] ss:$8 sps:$4 sm:$0xff]   ;;  %v2433_v42 = vld [vmem:[%s2877_s18 + $0xa4] ss:$8 sps:$4 sm:$0xff]  }
  0x4c   : > { %v2429_v39 = vld [vmem:[%s2877_s18 + $0x194] ss:$8 sps:$4 sm:$0xff]   ;;  %v2432_v41 = vld [vmem:[%s2877_s18 + $0x190] ss:$8 sps:$4 sm:$0xff]   ;;  %v2435_v43 = vld [vmem:[%s2877_s18 + $0x1a4] ss:$8 sps:$4 sm:$0xff]  }
  0x4d   : > { %1465 = vmatpush1.bf16.msra.mxu1 %v2395_v16  ;;  %v2437_v44 = vld [vmem:[%s2877_s18 + $0xa0] ss:$8 sps:$4 sm:$0xff]   ;;  %v2439_v46 = vld [vmem:[%s2877_s18 + $0xb4] ss:$8 sps:$4 sm:$0xff]   ;;  %v2443_v48 = vld [vmem:[%s2877_s18 + $0xb0] ss:$8 sps:$4 sm:$0xff]  }
  0x4e   : > { %1658 = vmatpush1.bf16.msra.mxu0 %v2396_v17  ;;  %1466 = vmatprep.subr.bf16.mxu1 %v2397_v18  ;;  %v2438_v45 = vld [vmem:[%s2877_s18 + $0x1a0] ss:$8 sps:$4 sm:$0xff]   ;;  %v2441_v47 = vld [vmem:[%s2877_s18 + $0x1b4] ss:$8 sps:$4 sm:$0xff]   ;;  %v2444_v49 = vld [vmem:[%s2877_s18 + $0x1b0] ss:$8 sps:$4 sm:$0xff]  }
  0x4f   : > { %1659 = vmatprep.subr.bf16.mxu0 %v2399_v19  ;;  %v2445_v50 = vld [vmem:[%s2877_s18 + $0xc4] ss:$8 sps:$4 sm:$0xff]   ;;  %v2449_v52 = vld [vmem:[%s2877_s18 + $0xc0] ss:$8 sps:$4 sm:$0xff]   ;;  %v2451_v54 = vld [vmem:[%s2877_s18 + $0xd4] ss:$8 sps:$4 sm:$0xff]  }
  0x50   : > { %v2447_v51 = vld [vmem:[%s2877_s18 + $0x1c4] ss:$8 sps:$4 sm:$0xff]   ;;  %v2450_v53 = vld [vmem:[%s2877_s18 + $0x1c0] ss:$8 sps:$4 sm:$0xff]   ;;  %v2453_v55 = vld [vmem:[%s2877_s18 + $0x1d4] ss:$8 sps:$4 sm:$0xff]  }
  0x51   : > { %1467 = vmatpush1.bf16.msra.mxu1 %v2401_v20  ;;  %v2455_v56 = vld [vmem:[%s2877_s18 + $0xd0] ss:$8 sps:$4 sm:$0xff]   ;;  %v2457_v58 = vld [vmem:[%s2877_s18 + $0xe4] ss:$8 sps:$4 sm:$0xff]   ;;  %v2461_v60 = vld [vmem:[%s2877_s18 + $0xe0] ss:$8 sps:$4 sm:$0xff]  }
  0x52   : > { %1660 = vmatpush1.bf16.msra.mxu0 %v2402_v21  ;;  %1468 = vmatprep.subr.bf16.mxu1 %v2403_v22  ;;  %v2456_v57 = vld [vmem:[%s2877_s18 + $0x1d0] ss:$8 sps:$4 sm:$0xff]   ;;  %v2459_v59 = vld [vmem:[%s2877_s18 + $0x1e4] ss:$8 sps:$4 sm:$0xff]   ;;  %v2462_v61 = vld [vmem:[%s2877_s18 + $0x1e0] ss:$8 sps:$4 sm:$0xff]  }
  0x53   : > { %1661 = vmatprep.subr.bf16.mxu0 %v2405_v23  ;;  %v2463_v62 = vld [vmem:[%s2877_s18 + $0xf4] ss:$8 sps:$4 sm:$0xff]   ;;  %v2467_v0 = vld [vmem:[%s2877_s18 + $0xf0] ss:$8 sps:$4 sm:$0xff]   ;;  %s3340_s27 = smov (!%p540_p0, %s2115_s27), 3  ;;  %s3140_s4 = scalar_lea.vmem [#allocation3], %s2868_s7 }
  0x54   : > { %v2465_v63 = vld [vmem:[%s2877_s18 + $0x1f4] ss:$8 sps:$4 sm:$0xff]   ;;  %v2468_v1 = vld [vmem:[%s2877_s18 + $0x1f0] ss:$8 sps:$4 sm:$0xff]   ;;  %s542_s30 = scalar_lea.vmem %s3328_s2, %s3340_s27  ;;  %s2250_s7 = sshll.u32 %s2635_s15, 8 }
  0x55   : > { %1469 = vmatpush1.bf16.msra.mxu1 %v2407_v24  ;;  %v2469_v2 = vld [vmem:[%s3326_s0] ss:$16 sps:$4 sm:$0xff]   ;;  %v2472_v3 = vld [vmem:[%s3326_s0 + $0x8] ss:$16 sps:$4 sm:$0xff]   ;;  %v2475_v4 = vld [vmem:[%s3326_s0 + $0x24] ss:$16 sps:$4 sm:$0xff]   ;;  %s3267_s15 = scalar_lea.hbm %s3329_s3, %s2250_s7 }
  0x56   : > { %1662 = vmatpush1.bf16.msra.mxu0 %v2408_v25  ;;  %1470 = vmatprep.subr.bf16.mxu1 %v2409_v26  ;;  %v2477_v5 = vld [vmem:[%s3326_s0 + $0x2c] ss:$16 sps:$4 sm:$0xff]   ;;  %v2479_v6 = vld [vmem:[%s3326_s0 + $0x20] ss:$16 sps:$4 sm:$0xff]   ;;  %v2480_v7 = vld [vmem:[%s3326_s0 + $0x28] ss:$16 sps:$4 sm:$0xff]  }
  0x57   : > { %1663 = vmatprep.subr.bf16.mxu0 %v2411_v27  ;;  %v2481_v8 = vld [vmem:[%s3326_s0 + $0x44] ss:$16 sps:$4 sm:$0xff]   ;;  %v2483_v9 = vld [vmem:[%s3326_s0 + $0x4c] ss:$16 sps:$4 sm:$0xff]   ;;  %v2485_v10 = vld [vmem:[%s3326_s0 + $0x40] ss:$16 sps:$4 sm:$0xff]  }
  0x58   : > { %v2486_v11 = vld [vmem:[%s3326_s0 + $0x48] ss:$16 sps:$4 sm:$0xff]   ;;  %v2487_v12 = vld [vmem:[%s3326_s0 + $0x64] ss:$16 sps:$4 sm:$0xff]   ;;  %v2489_v13 = vld [vmem:[%s3326_s0 + $0x6c] ss:$16 sps:$4 sm:$0xff]  }
  0x59   : > { %1471 = vmatpush1.bf16.msra.mxu1 %v2413_v28  ;;  %v2491_v14 = vld [vmem:[%s3326_s0 + $0x60] ss:$16 sps:$4 sm:$0xff]   ;;  %v2492_v15 = vld [vmem:[%s3326_s0 + $0x68] ss:$16 sps:$4 sm:$0xff]   ;;  %v2493_v16 = vld [vmem:[%s3326_s0 + $0x84] ss:$16 sps:$4 sm:$0xff]  }
  0x5a   : > { %1664 = vmatpush1.bf16.msra.mxu0 %v2414_v29  ;;  %1472 = vmatprep.subr.bf16.mxu1 %v2415_v30  ;;  %v2495_v17 = vld [vmem:[%s3326_s0 + $0x8c] ss:$16 sps:$4 sm:$0xff]   ;;  %v2497_v18 = vld [vmem:[%s3326_s0 + $0x80] ss:$16 sps:$4 sm:$0xff]   ;;  %v2498_v19 = vld [vmem:[%s3326_s0 + $0x88] ss:$16 sps:$4 sm:$0xff]  }
  0x5b   : > { %1665 = vmatprep.subr.bf16.mxu0 %v2417_v31  ;;  %v2499_v20 = vld [vmem:[%s3326_s0 + $0xa4] ss:$16 sps:$4 sm:$0xff]   ;;  %v2501_v21 = vld [vmem:[%s3326_s0 + $0xac] ss:$16 sps:$4 sm:$0xff]   ;;  %v2503_v22 = vld [vmem:[%s3326_s0 + $0xa0] ss:$16 sps:$4 sm:$0xff]  }
  0x5c   : > { %v2504_v23 = vld [vmem:[%s3326_s0 + $0xa8] ss:$16 sps:$4 sm:$0xff]   ;;  %v2505_v24 = vld [vmem:[%s3326_s0 + $0xc4] ss:$16 sps:$4 sm:$0xff]   ;;  %v2507_v25 = vld [vmem:[%s3326_s0 + $0xcc] ss:$16 sps:$4 sm:$0xff]  }
  0x5d   : > { %1473 = vmatpush1.bf16.msra.mxu1 %v2419_v32  ;;  %v2509_v26 = vld [vmem:[%s3326_s0 + $0xc0] ss:$16 sps:$4 sm:$0xff]   ;;  %v2510_v27 = vld [vmem:[%s3326_s0 + $0xc8] ss:$16 sps:$4 sm:$0xff]   ;;  %v2511_v28 = vld [vmem:[%s3326_s0 + $0xe4] ss:$16 sps:$4 sm:$0xff]  }
  0x5e   : > { %1666 = vmatpush1.bf16.msra.mxu0 %v2420_v33  ;;  %1474 = vmatprep.subr.bf16.mxu1 %v2421_v34  ;;  %v2513_v29 = vld [vmem:[%s3326_s0 + $0xec] ss:$16 sps:$4 sm:$0xff]   ;;  %v2515_v30 = vld [vmem:[%s3326_s0 + $0xe0] ss:$16 sps:$4 sm:$0xff]   ;;  %v2516_v31 = vld [vmem:[%s3326_s0 + $0xe8] ss:$16 sps:$4 sm:$0xff]  }
  0x5f   : > { %1667 = vmatprep.subr.bf16.mxu0 %v2423_v35  ;;  %v2517_v32 = vld [vmem:[%s3326_s0 + $0x104] ss:$16 sps:$4 sm:$0xff]   ;;  %v2519_v33 = vld [vmem:[%s3326_s0 + $0x10c] ss:$16 sps:$4 sm:$0xff]   ;;  %v2521_v34 = vld [vmem:[%s3326_s0 + $0x100] ss:$16 sps:$4 sm:$0xff]  }
  0x60   : > { %v2522_v35 = vld [vmem:[%s3326_s0 + $0x108] ss:$16 sps:$4 sm:$0xff]   ;;  %s1989_s5 = sshll.u32 %s3140_s4, 4  ;;  %s3279_s10 = scalar_lea.sflag [#allocation4], %s488_s6  ;;  %s3271_s5 = int_to_ptr.vmem [resolvable:$true] %s1989_s5 }
  0x61   : > { %1475 = vmatpush1.bf16.msra.mxu1 %v2425_v36  ;;  %v2523_v36 = vld [vmem:[%s3326_s0 + $0x124] ss:$16 sps:$4 sm:$0xff]   ;;  %s2565_s11 = scalar_lea.vmem %s3271_s5, 8192  ;;  %s2645_s18 = smov [#allocation3]  }
  0x62   : > { %1668 = vmatpush1.bf16.msra.mxu0 %v2426_v37  ;;  %1476 = vmatprep.subr.bf16.mxu1 %v2427_v38  ;;  %v2525_v37 = vld [vmem:[%s3326_s0 + $0x12c] ss:$16 sps:$4 sm:$0xff]   ;;  %v2527_v38 = vld [vmem:[%s3326_s0 + $0x120] ss:$16 sps:$4 sm:$0xff]   ;;  %p2566_p1 = scmp.ne.s32.totalorder %s3271_s5, %s2565_s11  ;;  %s2569_s19 = sshll.u32 %s2645_s18, 4  ;;  %s2570_s19 = int_to_ptr.vmem [resolvable:$false] %s2569_s19 }
  0x63   : > { %1669 = vmatprep.subr.bf16.mxu0 %v2429_v39  ;;  %v2528_v39 = vld [vmem:[%s3326_s0 + $0x128] ss:$16 sps:$4 sm:$0xff]   ;;  %s2571_s21 = scalar_lea.vmem %s2570_s19, 16384  ;;  %p2572_p4 = scmp.lt.s32.totalorder %s3271_s5, %s2570_s19 }
  0x64   : > { %p2567_p2 = pnand %p2566_p1, %p2708_p5  ;;  %p2573_p6 = scmp.lt.s32.totalorder %s2571_s21, %s2565_s11 }
  0x65   : > { %1477 = vmatpush1.bf16.msra.mxu1 %v2431_v40  ;;  %v2529_v40 = vld [vmem:[%s3326_s0 + $0x144] ss:$16 sps:$4 sm:$0xff]  }
  0x66   : > { %1670 = vmatpush1.bf16.msra.mxu0 %v2432_v41  ;;  %1478 = vmatprep.subr.bf16.mxu1 %v2433_v42  ;;  %v2531_v41 = vld [vmem:[%s3326_s0 + $0x14c] ss:$16 sps:$4 sm:$0xff]   ;;  %v2533_v42 = vld [vmem:[%s3326_s0 + $0x140] ss:$16 sps:$4 sm:$0xff]   ;;  %p2568_p3 = pneg %p2567_p2  ;;  %p2574_p7 = por %p2573_p6, %p2572_p4 }
  0x67   : > { %1671 = vmatprep.subr.bf16.mxu0 %v2435_v43  ;;  %v2534_v43 = vld [vmem:[%s3326_s0 + $0x148] ss:$16 sps:$4 sm:$0xff]  }
  0x68   : > { %p2575_p8 = pnand %p2574_p7, %p2568_p3 }
  0x69   : > { %1479 = vmatpush1.bf16.msra.mxu1 %v2437_v44  ;;  %v2535_v44 = vld [vmem:[%s3326_s0 + $0x164] ss:$16 sps:$4 sm:$0xff]  }
  0x6a   : > { %1672 = vmatpush1.bf16.msra.mxu0 %v2438_v45  ;;  %1480 = vmatprep.subr.bf16.mxu1 %v2439_v46  ;;  %v2537_v45 = vld [vmem:[%s3326_s0 + $0x16c] ss:$16 sps:$4 sm:$0xff]   ;;  %v2539_v46 = vld [vmem:[%s3326_s0 + $0x160] ss:$16 sps:$4 sm:$0xff]  }
  0x6b   : > { %1673 = vmatprep.subr.bf16.mxu0 %v2441_v47  ;;  %v2540_v47 = vld [vmem:[%s3326_s0 + $0x168] ss:$16 sps:$4 sm:$0xff]  }
  0x6d   : > { %1481 = vmatpush1.bf16.msra.mxu1 %v2443_v48  ;;  %v2541_v48 = vld [vmem:[%s3326_s0 + $0x184] ss:$16 sps:$4 sm:$0xff]  }
  0x6e   : > { %1674 = vmatpush1.bf16.msra.mxu0 %v2444_v49  ;;  %1482 = vmatprep.subr.bf16.mxu1 %v2445_v50  ;;  %v2543_v49 = vld [vmem:[%s3326_s0 + $0x18c] ss:$16 sps:$4 sm:$0xff]   ;;  %v2545_v50 = vld [vmem:[%s3326_s0 + $0x180] ss:$16 sps:$4 sm:$0xff]  }
  0x6f   : > { %1675 = vmatprep.subr.bf16.mxu0 %v2447_v51  ;;  %v2546_v51 = vld [vmem:[%s3326_s0 + $0x188] ss:$16 sps:$4 sm:$0xff]  }
  0x71   : > { %1483 = vmatpush1.bf16.msra.mxu1 %v2449_v52  ;;  %v2547_v52 = vld [vmem:[%s3326_s0 + $0x1a4] ss:$16 sps:$4 sm:$0xff]  }
  0x72   : > { %1676 = vmatpush1.bf16.msra.mxu0 %v2450_v53  ;;  %1484 = vmatprep.subr.bf16.mxu1 %v2451_v54  ;;  %v2549_v53 = vld [vmem:[%s3326_s0 + $0x1ac] ss:$16 sps:$4 sm:$0xff]   ;;  %v2551_v54 = vld [vmem:[%s3326_s0 + $0x1a0] ss:$16 sps:$4 sm:$0xff]  }
  0x73   : > { %1677 = vmatprep.subr.bf16.mxu0 %v2453_v55  ;;  %v2552_v55 = vld [vmem:[%s3326_s0 + $0x1a8] ss:$16 sps:$4 sm:$0xff]  }
  0x75   : > { %1485 = vmatpush1.bf16.msra.mxu1 %v2455_v56  ;;  %v2553_v56 = vld [vmem:[%s3326_s0 + $0x1c4] ss:$16 sps:$4 sm:$0xff]  }
  0x76   : > { %1678 = vmatpush1.bf16.msra.mxu0 %v2456_v57  ;;  %1486 = vmatprep.subr.bf16.mxu1 %v2457_v58  ;;  %v2555_v57 = vld [vmem:[%s3326_s0 + $0x1cc] ss:$16 sps:$4 sm:$0xff]   ;;  %v2557_v58 = vld [vmem:[%s3326_s0 + $0x1c0] ss:$16 sps:$4 sm:$0xff]  }
  0x77   : > { %1679 = vmatprep.subr.bf16.mxu0 %v2459_v59  ;;  %v2558_v59 = vld [vmem:[%s3326_s0 + $0x1c8] ss:$16 sps:$4 sm:$0xff]  }
  0x79   : > { %1487 = vmatpush1.bf16.msra.mxu1 %v2461_v60  ;;  %v2559_v60 = vld [vmem:[%s3326_s0 + $0x1e4] ss:$16 sps:$4 sm:$0xff]  }
  0x7a   : > { %1680 = vmatpush1.bf16.msra.mxu0 %v2462_v61  ;;  %1488 = vmatprep.subr.bf16.mxu1 %v2463_v62  ;;  %v2561_v61 = vld [vmem:[%s3326_s0 + $0x1ec] ss:$16 sps:$4 sm:$0xff]   ;;  %v2563_v62 = vld [vmem:[%s3326_s0 + $0x1e0] ss:$16 sps:$4 sm:$0xff]  }
  0x7b   : > { %1681 = vmatprep.subr.bf16.mxu0 %v2465_v63  ;;  %v2564_v63 = vld [vmem:[%s3326_s0 + $0x1e8] ss:$16 sps:$4 sm:$0xff]  }
  0x7d   : > { %1489 = vmatpush1.bf16.msra.mxu1 %v2467_v0  ;;  %v552_v0 = vlaneseq }
  0x7e   : > { %1682 = vmatpush1.bf16.msra.mxu0 %v2468_v1 }
  0x7f   : > { %v553_v1 = vshrl.u32 %v552_v0, 7 }
  0x80   : > { %1491 = vmatmul.mubr.bf16.vlgmr.msra.gmra.mrb[0].mxu1 %v2469_v2 }
  0x81   : > { %1684 = vmatmul.mubr.bf16.vlgmr.msra.gmra.mrb[0].mxu0 %v2472_v3  ;;  %1500 = vmatprep.mubr.bf16.mxu1 %v2475_v4  ;;  %v554_v2 = vsub.s32 0, %v553_v1  ;;  %v550_v3 = vld [vmem:[%s542_s30] sm:$0x3]  ;;  %v558_v4 = vsub.s32 1, %v553_v1 }
  0x82   : > { %1693 = vmatprep.mubr.bf16.mxu0 %v2477_v5 }
  0x83   : > { %v3133_v5 = vrot.slane %v550_v3, %v554_v2 }
  0x88   : > { %1501 = vmatmul.mubr.bf16.gmra.mrb[4].mxu1 %v2479_v6 }
  0x89   : > { %1694 = vmatmul.mubr.bf16.gmra.mrb[4].mxu0 %v2480_v7  ;;  %1510 = vmatprep.mubr.bf16.mxu1 %v2481_v8  ;;  %v3135_v8 = vrot.slane %v550_v3, %v558_v4 }
  0x8a   : > { %1703 = vmatprep.mubr.bf16.mxu0 %v2483_v9 }
  0x90   : > { %1511 = vmatmul.mubr.bf16.gmra.mrb[8].mxu1 %v2485_v10 }
  0x91   : > { %1704 = vmatmul.mubr.bf16.gmra.mrb[8].mxu0 %v2486_v11  ;;  %1520 = vmatprep.mubr.bf16.mxu1 %v2487_v12 }
  0x92   : > { %1713 = vmatprep.mubr.bf16.mxu0 %v2489_v13 }
  0x98   : > { %1521 = vmatmul.mubr.bf16.gmra.mrb[12].mxu1 %v2491_v14 }
  0x99   : > { %1714 = vmatmul.mubr.bf16.gmra.mrb[12].mxu0 %v2492_v15  ;;  %1530 = vmatprep.mubr.bf16.mxu1 %v2493_v16 }
  0x9a   : > { %1723 = vmatprep.mubr.bf16.mxu0 %v2495_v17 }
  0xa0   : > { %1531 = vmatmul.mubr.bf16.gmra.mrb[16].mxu1 %v2497_v18 }
  0xa1   : > { %1724 = vmatmul.mubr.bf16.gmra.mrb[16].mxu0 %v2498_v19  ;;  %1540 = vmatprep.mubr.bf16.mxu1 %v2499_v20 }
  0xa2   : > { %1733 = vmatprep.mubr.bf16.mxu0 %v2501_v21 }
  0xa8   : > { %1541 = vmatmul.mubr.bf16.gmra.mrb[20].mxu1 %v2503_v22 }
  0xa9   : > { %1734 = vmatmul.mubr.bf16.gmra.mrb[20].mxu0 %v2504_v23  ;;  %1550 = vmatprep.mubr.bf16.mxu1 %v2505_v24 }
  0xaa   : > { %1743 = vmatprep.mubr.bf16.mxu0 %v2507_v25 }
  0xb0   : > { %1551 = vmatmul.mubr.bf16.gmra.mrb[24].mxu1 %v2509_v26 }
  0xb1   : > { %1744 = vmatmul.mubr.bf16.gmra.mrb[24].mxu0 %v2510_v27  ;;  %1560 = vmatprep.mubr.bf16.mxu1 %v2511_v28 }
  0xb2   : > { %1753 = vmatprep.mubr.bf16.mxu0 %v2513_v29 }
  0xb8   : > { %1561 = vmatmul.mubr.bf16.gmra.mrb[28].mxu1 %v2515_v30 }
  0xb9   : > { %1754 = vmatmul.mubr.bf16.gmra.mrb[28].mxu0 %v2516_v31  ;;  %1570 = vmatprep.mubr.bf16.mxu1 %v2517_v32 }
  0xba   : > { %1763 = vmatprep.mubr.bf16.mxu0 %v2519_v33 }
  0xc0   : > { %1571 = vmatmul.mubr.bf16.gmra.mrb[32].mxu1 %v2521_v34 }
  0xc1   : > { %1764 = vmatmul.mubr.bf16.gmra.mrb[32].mxu0 %v2522_v35  ;;  %1580 = vmatprep.mubr.bf16.mxu1 %v2523_v36 }
  0xc2   : > { %1773 = vmatprep.mubr.bf16.mxu0 %v2525_v37 }
  0xc8   : > { %1581 = vmatmul.mubr.bf16.gmra.mrb[36].mxu1 %v2527_v38 }
  0xc9   : > { %1774 = vmatmul.mubr.bf16.gmra.mrb[36].mxu0 %v2528_v39  ;;  %1590 = vmatprep.mubr.bf16.mxu1 %v2529_v40 }
  0xca   : > { %1783 = vmatprep.mubr.bf16.mxu0 %v2531_v41 }
  0xd0   : > { %1591 = vmatmul.mubr.bf16.gmra.mrb[40].mxu1 %v2533_v42 }
  0xd1   : > { %1784 = vmatmul.mubr.bf16.gmra.mrb[40].mxu0 %v2534_v43  ;;  %1600 = vmatprep.mubr.bf16.mxu1 %v2535_v44 }
  0xd2   : > { %1793 = vmatprep.mubr.bf16.mxu0 %v2537_v45 }
  0xd8   : > { %1601 = vmatmul.mubr.bf16.gmra.mrb[44].mxu1 %v2539_v46 }
  0xd9   : > { %1794 = vmatmul.mubr.bf16.gmra.mrb[44].mxu0 %v2540_v47  ;;  %1610 = vmatprep.mubr.bf16.mxu1 %v2541_v48 }
  0xda   : > { %1803 = vmatprep.mubr.bf16.mxu0 %v2543_v49 }
  0xe0   : > { %1611 = vmatmul.mubr.bf16.gmra.mrb[48].mxu1 %v2545_v50 }
  0xe1   : > { %1804 = vmatmul.mubr.bf16.gmra.mrb[48].mxu0 %v2546_v51  ;;  %1620 = vmatprep.mubr.bf16.mxu1 %v2547_v52 }
  0xe2   : > { %1813 = vmatprep.mubr.bf16.mxu0 %v2549_v53 }
  0xe8   : > { %1621 = vmatmul.mubr.bf16.gmra.mrb[52].mxu1 %v2551_v54 }
  0xe9   : > { %1814 = vmatmul.mubr.bf16.gmra.mrb[52].mxu0 %v2552_v55  ;;  %1630 = vmatprep.mubr.bf16.mxu1 %v2553_v56 }
  0xea   : > { %1823 = vmatprep.mubr.bf16.mxu0 %v2555_v57 }
  0xf0   : > { %1631 = vmatmul.mubr.bf16.gmra.mrb[56].mxu1 %v2557_v58 }
  0xf1   : > { %1824 = vmatmul.mubr.bf16.gmra.mrb[56].mxu0 %v2558_v59  ;;  %1640 = vmatprep.mubr.bf16.mxu1 %v2559_v60 }
  0xf2   : > { %1833 = vmatprep.mubr.bf16.mxu0 %v2561_v61 }
  0xf8   : > { %1641 = vmatmul.mubr.bf16.gmra.mrb[60].mxu1 %v2563_v62 }
  0xf9   : > { %1834 = vmatmul.mubr.bf16.gmra.mrb[60].mxu0 %v2564_v63 }
 0x153   : > { %v1492_v6 = vpop.f32.mrb[0].mxu1 }
 0x154   : > { %v1685_v7 = vpop.f32.mrb[0].mxu0  ;;  %v1494_v10 = vpop.f32.mrb[1].mxu1 }
 0x155   : > { %v1686_v9 = vadd.f32 %v1685_v7, %v1492_v6  ;;  %v1687_v11 = vpop.f32.mrb[1].mxu0  ;;  %v1496_v13 = vpop.f32.mrb[2].mxu1 }
 0x156   : > { %v1688_v12 = vadd.f32 %v1687_v11, %v1494_v10  ;;  %v1689_v14 = vpop.f32.mrb[2].mxu0  ;;  %v1498_v17 = vpop.f32.mrb[3].mxu1 }
 0x157   : > { %v1844_v15 = vadd.f32 %v1686_v9, %v3133_v5  ;;  %v1690_v16 = vadd.f32 %v1689_v14, %v1496_v13  ;;  %v1691_v18 = vpop.f32.mrb[3].mxu0 }
 0x158   : > { %v1845_v19 = vadd.f32 %v1688_v12, %v3135_v8  ;;  %v1692_v20 = vadd.f32 %v1691_v18, %v1498_v17 }
 0x159   : > { %1908 = vst [vmem:[%s3140_s4] sm:$0xff] %v1844_v15  ;;  %v1846_v21 = vadd.f32 %v1690_v16, %v3133_v5 }
 0x15a   : > { %1909 = vst [vmem:[%s3140_s4 + $0x8] sm:$0xff] %v1845_v19  ;;  %v1847_v22 = vadd.f32 %v1692_v20, %v3135_v8 }
 0x15b   : > { %1910 = vst [vmem:[%s3140_s4 + $0x10] sm:$0xff] %v1846_v21  ;;  %v1502_v23 = vpop.f32.mrb[4].mxu1 }
 0x15c   : > { %1911 = vst [vmem:[%s3140_s4 + $0x18] sm:$0xff] %v1847_v22  ;;  %v1695_v24 = vpop.f32.mrb[4].mxu0  ;;  %v1504_v26 = vpop.f32.mrb[5].mxu1 }
 0x15d   : > { %v1696_v25 = vadd.f32 %v1695_v24, %v1502_v23  ;;  %v1697_v27 = vpop.f32.mrb[5].mxu0  ;;  %v1506_v29 = vpop.f32.mrb[6].mxu1 }
 0x15e   : > { %v1698_v28 = vadd.f32 %v1697_v27, %v1504_v26  ;;  %v1699_v30 = vpop.f32.mrb[6].mxu0  ;;  %v1508_v33 = vpop.f32.mrb[7].mxu1 }
 0x15f   : > { %v1848_v31 = vadd.f32 %v1696_v25, %v3133_v5  ;;  %v1700_v32 = vadd.f32 %v1699_v30, %v1506_v29  ;;  %v1701_v34 = vpop.f32.mrb[7].mxu0 }
 0x160   : > { %v1849_v35 = vadd.f32 %v1698_v28, %v3135_v8  ;;  %v1702_v36 = vadd.f32 %v1701_v34, %v1508_v33 }
 0x161   : > { %1912 = vst [vmem:[%s3140_s4 + $0x20] sm:$0xff] %v1848_v31  ;;  %v1850_v37 = vadd.f32 %v1700_v32, %v3133_v5 }
 0x162   : > { %1913 = vst [vmem:[%s3140_s4 + $0x28] sm:$0xff] %v1849_v35  ;;  %v1851_v38 = vadd.f32 %v1702_v36, %v3135_v8 }
 0x163   : > { %1914 = vst [vmem:[%s3140_s4 + $0x30] sm:$0xff] %v1850_v37  ;;  %v1512_v39 = vpop.f32.mrb[8].mxu1 }
 0x164   : > { %1915 = vst [vmem:[%s3140_s4 + $0x38] sm:$0xff] %v1851_v38  ;;  %v1705_v40 = vpop.f32.mrb[8].mxu0  ;;  %v1514_v42 = vpop.f32.mrb[9].mxu1 }
 0x165   : > { %v1706_v41 = vadd.f32 %v1705_v40, %v1512_v39  ;;  %v1707_v43 = vpop.f32.mrb[9].mxu0  ;;  %v1516_v45 = vpop.f32.mrb[10].mxu1 }
 0x166   : > { %v1708_v44 = vadd.f32 %v1707_v43, %v1514_v42  ;;  %v1709_v46 = vpop.f32.mrb[10].mxu0  ;;  %v1518_v49 = vpop.f32.mrb[11].mxu1 }
 0x167   : > { %v1852_v47 = vadd.f32 %v1706_v41, %v3133_v5  ;;  %v1710_v48 = vadd.f32 %v1709_v46, %v1516_v45  ;;  %v1711_v50 = vpop.f32.mrb[11].mxu0 }
 0x168   : > { %v1853_v51 = vadd.f32 %v1708_v44, %v3135_v8  ;;  %v1712_v52 = vadd.f32 %v1711_v50, %v1518_v49 }
 0x169   : > { %1916 = vst [vmem:[%s3140_s4 + $0x40] sm:$0xff] %v1852_v47  ;;  %v1854_v53 = vadd.f32 %v1710_v48, %v3133_v5 }
 0x16a   : > { %1917 = vst [vmem:[%s3140_s4 + $0x48] sm:$0xff] %v1853_v51  ;;  %v1855_v54 = vadd.f32 %v1712_v52, %v3135_v8 }
 0x16b   : > { %1918 = vst [vmem:[%s3140_s4 + $0x50] sm:$0xff] %v1854_v53  ;;  %v1522_v55 = vpop.f32.mrb[12].mxu1 }
 0x16c   : > { %1919 = vst [vmem:[%s3140_s4 + $0x58] sm:$0xff] %v1855_v54  ;;  %v1715_v56 = vpop.f32.mrb[12].mxu0  ;;  %v1524_v58 = vpop.f32.mrb[13].mxu1 }
 0x16d   : > { %v1716_v57 = vadd.f32 %v1715_v56, %v1522_v55  ;;  %v1717_v59 = vpop.f32.mrb[13].mxu0  ;;  %v1526_v61 = vpop.f32.mrb[14].mxu1 }
 0x16e   : > { %v1718_v60 = vadd.f32 %v1717_v59, %v1524_v58  ;;  %v1719_v62 = vpop.f32.mrb[14].mxu0  ;;  %v1528_v1 = vpop.f32.mrb[15].mxu1 }
 0x16f   : > { %v1856_v63 = vadd.f32 %v1716_v57, %v3133_v5  ;;  %v1720_v0 = vadd.f32 %v1719_v62, %v1526_v61  ;;  %v1721_v2 = vpop.f32.mrb[15].mxu0 }
 0x170   : > { %v1857_v3 = vadd.f32 %v1718_v60, %v3135_v8  ;;  %v1722_v4 = vadd.f32 %v1721_v2, %v1528_v1 }
 0x171   : > { %1920 = vst [vmem:[%s3140_s4 + $0x60] sm:$0xff] %v1856_v63  ;;  %v1858_v6 = vadd.f32 %v1720_v0, %v3133_v5 }
 0x172   : > { %1921 = vst [vmem:[%s3140_s4 + $0x68] sm:$0xff] %v1857_v3  ;;  %v1859_v7 = vadd.f32 %v1722_v4, %v3135_v8 }
 0x173   : > { %1922 = vst [vmem:[%s3140_s4 + $0x70] sm:$0xff] %v1858_v6  ;;  %v1532_v9 = vpop.f32.mrb[16].mxu1 }
 0x174   : > { %1923 = vst [vmem:[%s3140_s4 + $0x78] sm:$0xff] %v1859_v7  ;;  %v1725_v10 = vpop.f32.mrb[16].mxu0  ;;  %v1534_v12 = vpop.f32.mrb[17].mxu1 }
 0x175   : > { %v1726_v11 = vadd.f32 %v1725_v10, %v1532_v9  ;;  %v1727_v13 = vpop.f32.mrb[17].mxu0  ;;  %v1536_v15 = vpop.f32.mrb[18].mxu1 }
 0x176   : > { %v1728_v14 = vadd.f32 %v1727_v13, %v1534_v12  ;;  %v1729_v16 = vpop.f32.mrb[18].mxu0  ;;  %v1538_v19 = vpop.f32.mrb[19].mxu1 }
 0x177   : > { %v1860_v17 = vadd.f32 %v1726_v11, %v3133_v5  ;;  %v1730_v18 = vadd.f32 %v1729_v16, %v1536_v15  ;;  %v1731_v20 = vpop.f32.mrb[19].mxu0 }
 0x178   : > { %v1861_v21 = vadd.f32 %v1728_v14, %v3135_v8  ;;  %v1732_v22 = vadd.f32 %v1731_v20, %v1538_v19 }
 0x179   : > { %1924 = vst [vmem:[%s3140_s4 + $0x80] sm:$0xff] %v1860_v17  ;;  %v1862_v23 = vadd.f32 %v1730_v18, %v3133_v5 }
 0x17a   : > { %1925 = vst [vmem:[%s3140_s4 + $0x88] sm:$0xff] %v1861_v21  ;;  %v1863_v24 = vadd.f32 %v1732_v22, %v3135_v8 }
 0x17b   : > { %1926 = vst [vmem:[%s3140_s4 + $0x90] sm:$0xff] %v1862_v23  ;;  %v1542_v25 = vpop.f32.mrb[20].mxu1 }
 0x17c   : > { %1927 = vst [vmem:[%s3140_s4 + $0x98] sm:$0xff] %v1863_v24  ;;  %v1735_v26 = vpop.f32.mrb[20].mxu0  ;;  %v1544_v28 = vpop.f32.mrb[21].mxu1 }
 0x17d   : > { %v1736_v27 = vadd.f32 %v1735_v26, %v1542_v25  ;;  %v1737_v29 = vpop.f32.mrb[21].mxu0  ;;  %v1546_v31 = vpop.f32.mrb[22].mxu1 }
 0x17e   : > { %v1738_v30 = vadd.f32 %v1737_v29, %v1544_v28  ;;  %v1739_v32 = vpop.f32.mrb[22].mxu0  ;;  %v1548_v35 = vpop.f32.mrb[23].mxu1 }
 0x17f   : > { %v1864_v33 = vadd.f32 %v1736_v27, %v3133_v5  ;;  %v1740_v34 = vadd.f32 %v1739_v32, %v1546_v31  ;;  %v1741_v36 = vpop.f32.mrb[23].mxu0 }
 0x180   : > { %v1865_v37 = vadd.f32 %v1738_v30, %v3135_v8  ;;  %v1742_v38 = vadd.f32 %v1741_v36, %v1548_v35 }
 0x181   : > { %1928 = vst [vmem:[%s3140_s4 + $0xa0] sm:$0xff] %v1864_v33  ;;  %v1866_v39 = vadd.f32 %v1740_v34, %v3133_v5 }
 0x182   : > { %1929 = vst [vmem:[%s3140_s4 + $0xa8] sm:$0xff] %v1865_v37  ;;  %v1867_v40 = vadd.f32 %v1742_v38, %v3135_v8 }
 0x183   : > { %1930 = vst [vmem:[%s3140_s4 + $0xb0] sm:$0xff] %v1866_v39  ;;  %v1552_v41 = vpop.f32.mrb[24].mxu1 }
 0x184   : > { %1931 = vst [vmem:[%s3140_s4 + $0xb8] sm:$0xff] %v1867_v40  ;;  %v1745_v42 = vpop.f32.mrb[24].mxu0  ;;  %v1554_v44 = vpop.f32.mrb[25].mxu1 }
 0x185   : > { %v1746_v43 = vadd.f32 %v1745_v42, %v1552_v41  ;;  %v1747_v45 = vpop.f32.mrb[25].mxu0  ;;  %v1556_v47 = vpop.f32.mrb[26].mxu1 }
 0x186   : > { %v1748_v46 = vadd.f32 %v1747_v45, %v1554_v44  ;;  %v1749_v48 = vpop.f32.mrb[26].mxu0  ;;  %v1558_v51 = vpop.f32.mrb[27].mxu1 }
 0x187   : > { %v1868_v49 = vadd.f32 %v1746_v43, %v3133_v5  ;;  %v1750_v50 = vadd.f32 %v1749_v48, %v1556_v47  ;;  %v1751_v52 = vpop.f32.mrb[27].mxu0 }
 0x188   : > { %v1869_v53 = vadd.f32 %v1748_v46, %v3135_v8  ;;  %v1752_v54 = vadd.f32 %v1751_v52, %v1558_v51 }
 0x189   : > { %1932 = vst [vmem:[%s3140_s4 + $0xc0] sm:$0xff] %v1868_v49  ;;  %v1870_v55 = vadd.f32 %v1750_v50, %v3133_v5 }
 0x18a   : > { %1933 = vst [vmem:[%s3140_s4 + $0xc8] sm:$0xff] %v1869_v53  ;;  %v1871_v56 = vadd.f32 %v1752_v54, %v3135_v8 }
 0x18b   : > { %1934 = vst [vmem:[%s3140_s4 + $0xd0] sm:$0xff] %v1870_v55  ;;  %v1562_v57 = vpop.f32.mrb[28].mxu1 }
 0x18c   : > { %1935 = vst [vmem:[%s3140_s4 + $0xd8] sm:$0xff] %v1871_v56  ;;  %v1755_v58 = vpop.f32.mrb[28].mxu0  ;;  %v1564_v60 = vpop.f32.mrb[29].mxu1 }
 0x18d   : > { %v1756_v59 = vadd.f32 %v1755_v58, %v1562_v57  ;;  %v1757_v61 = vpop.f32.mrb[29].mxu0  ;;  %v1566_v63 = vpop.f32.mrb[30].mxu1 }
 0x18e   : > { %v1758_v62 = vadd.f32 %v1757_v61, %v1564_v60  ;;  %v1759_v0 = vpop.f32.mrb[30].mxu0  ;;  %v1568_v3 = vpop.f32.mrb[31].mxu1 }
 0x18f   : > { %v1872_v1 = vadd.f32 %v1756_v59, %v3133_v5  ;;  %v1760_v2 = vadd.f32 %v1759_v0, %v1566_v63  ;;  %v1761_v4 = vpop.f32.mrb[31].mxu0 }
 0x190   : > { %v1873_v6 = vadd.f32 %v1758_v62, %v3135_v8  ;;  %v1762_v7 = vadd.f32 %v1761_v4, %v1568_v3 }
 0x191   : > { %1936 = vst [vmem:[%s3140_s4 + $0xe0] sm:$0xff] %v1872_v1  ;;  %v1874_v9 = vadd.f32 %v1760_v2, %v3133_v5 }
 0x192   : > { %1937 = vst [vmem:[%s3140_s4 + $0xe8] sm:$0xff] %v1873_v6  ;;  %v1875_v10 = vadd.f32 %v1762_v7, %v3135_v8 }
 0x193   : > { %1938 = vst [vmem:[%s3140_s4 + $0xf0] sm:$0xff] %v1874_v9  ;;  %v1572_v11 = vpop.f32.mrb[32].mxu1 }
 0x194   : > { %1939 = vst [vmem:[%s3140_s4 + $0xf8] sm:$0xff] %v1875_v10  ;;  %v1765_v12 = vpop.f32.mrb[32].mxu0  ;;  %v1574_v14 = vpop.f32.mrb[33].mxu1 }
 0x195   : > { %v1766_v13 = vadd.f32 %v1765_v12, %v1572_v11  ;;  %v1767_v15 = vpop.f32.mrb[33].mxu0  ;;  %v1576_v17 = vpop.f32.mrb[34].mxu1 }
 0x196   : > { %v1768_v16 = vadd.f32 %v1767_v15, %v1574_v14  ;;  %v1769_v18 = vpop.f32.mrb[34].mxu0  ;;  %v1578_v21 = vpop.f32.mrb[35].mxu1 }
 0x197   : > { %v1876_v19 = vadd.f32 %v1766_v13, %v3133_v5  ;;  %v1770_v20 = vadd.f32 %v1769_v18, %v1576_v17  ;;  %v1771_v22 = vpop.f32.mrb[35].mxu0 }
 0x198   : > { %v1877_v23 = vadd.f32 %v1768_v16, %v3135_v8  ;;  %v1772_v24 = vadd.f32 %v1771_v22, %v1578_v21 }
 0x199   : > { %1940 = vst [vmem:[%s3140_s4 + $0x100] sm:$0xff] %v1876_v19  ;;  %v1878_v25 = vadd.f32 %v1770_v20, %v3133_v5 }
 0x19a   : > { %1941 = vst [vmem:[%s3140_s4 + $0x108] sm:$0xff] %v1877_v23  ;;  %v1879_v26 = vadd.f32 %v1772_v24, %v3135_v8 }
 0x19b   : > { %1942 = vst [vmem:[%s3140_s4 + $0x110] sm:$0xff] %v1878_v25  ;;  %v1582_v27 = vpop.f32.mrb[36].mxu1 }
 0x19c   : > { %1943 = vst [vmem:[%s3140_s4 + $0x118] sm:$0xff] %v1879_v26  ;;  %v1775_v28 = vpop.f32.mrb[36].mxu0  ;;  %v1584_v30 = vpop.f32.mrb[37].mxu1 }
 0x19d   : > { %v1776_v29 = vadd.f32 %v1775_v28, %v1582_v27  ;;  %v1777_v31 = vpop.f32.mrb[37].mxu0  ;;  %v1586_v33 = vpop.f32.mrb[38].mxu1 }
 0x19e   : > { %v1778_v32 = vadd.f32 %v1777_v31, %v1584_v30  ;;  %v1779_v34 = vpop.f32.mrb[38].mxu0  ;;  %v1588_v37 = vpop.f32.mrb[39].mxu1 }
 0x19f   : > { %v1880_v35 = vadd.f32 %v1776_v29, %v3133_v5  ;;  %v1780_v36 = vadd.f32 %v1779_v34, %v1586_v33  ;;  %v1781_v38 = vpop.f32.mrb[39].mxu0 }
 0x1a0   : > { %v1881_v39 = vadd.f32 %v1778_v32, %v3135_v8  ;;  %v1782_v40 = vadd.f32 %v1781_v38, %v1588_v37 }
 0x1a1   : > { %1944 = vst [vmem:[%s3140_s4 + $0x120] sm:$0xff] %v1880_v35  ;;  %v1882_v41 = vadd.f32 %v1780_v36, %v3133_v5 }
 0x1a2   : > { %1945 = vst [vmem:[%s3140_s4 + $0x128] sm:$0xff] %v1881_v39  ;;  %v1883_v42 = vadd.f32 %v1782_v40, %v3135_v8 }
 0x1a3   : > { %1946 = vst [vmem:[%s3140_s4 + $0x130] sm:$0xff] %v1882_v41  ;;  %v1592_v43 = vpop.f32.mrb[40].mxu1 }
 0x1a4   : > { %1947 = vst [vmem:[%s3140_s4 + $0x138] sm:$0xff] %v1883_v42  ;;  %v1785_v44 = vpop.f32.mrb[40].mxu0  ;;  %v1594_v46 = vpop.f32.mrb[41].mxu1 }
 0x1a5   : > { %v1786_v45 = vadd.f32 %v1785_v44, %v1592_v43  ;;  %v1787_v47 = vpop.f32.mrb[41].mxu0  ;;  %v1596_v49 = vpop.f32.mrb[42].mxu1 }
 0x1a6   : > { %v1788_v48 = vadd.f32 %v1787_v47, %v1594_v46  ;;  %v1789_v50 = vpop.f32.mrb[42].mxu0  ;;  %v1598_v53 = vpop.f32.mrb[43].mxu1 }
 0x1a7   : > { %v1884_v51 = vadd.f32 %v1786_v45, %v3133_v5  ;;  %v1790_v52 = vadd.f32 %v1789_v50, %v1596_v49  ;;  %v1791_v54 = vpop.f32.mrb[43].mxu0 }
 0x1a8   : > { %v1885_v55 = vadd.f32 %v1788_v48, %v3135_v8  ;;  %v1792_v56 = vadd.f32 %v1791_v54, %v1598_v53 }
 0x1a9   : > { %1948 = vst [vmem:[%s3140_s4 + $0x140] sm:$0xff] %v1884_v51  ;;  %v1886_v57 = vadd.f32 %v1790_v52, %v3133_v5 }
 0x1aa   : > { %1949 = vst [vmem:[%s3140_s4 + $0x148] sm:$0xff] %v1885_v55  ;;  %v1887_v58 = vadd.f32 %v1792_v56, %v3135_v8 }
 0x1ab   : > { %1950 = vst [vmem:[%s3140_s4 + $0x150] sm:$0xff] %v1886_v57  ;;  %v1602_v59 = vpop.f32.mrb[44].mxu1 }
 0x1ac   : > { %1951 = vst [vmem:[%s3140_s4 + $0x158] sm:$0xff] %v1887_v58  ;;  %v1795_v60 = vpop.f32.mrb[44].mxu0  ;;  %v1604_v62 = vpop.f32.mrb[45].mxu1 }
 0x1ad   : > { %v1796_v61 = vadd.f32 %v1795_v60, %v1602_v59  ;;  %v1797_v63 = vpop.f32.mrb[45].mxu0  ;;  %v1606_v1 = vpop.f32.mrb[46].mxu1 }
 0x1ae   : > { %v1798_v0 = vadd.f32 %v1797_v63, %v1604_v62  ;;  %v1799_v2 = vpop.f32.mrb[46].mxu0  ;;  %v1608_v6 = vpop.f32.mrb[47].mxu1 }
 0x1af   : > { %v1888_v3 = vadd.f32 %v1796_v61, %v3133_v5  ;;  %v1800_v4 = vadd.f32 %v1799_v2, %v1606_v1  ;;  %v1801_v7 = vpop.f32.mrb[47].mxu0 }
 0x1b0   : > { %v1889_v9 = vadd.f32 %v1798_v0, %v3135_v8  ;;  %v1802_v10 = vadd.f32 %v1801_v7, %v1608_v6 }
 0x1b1   : > { %1952 = vst [vmem:[%s3140_s4 + $0x160] sm:$0xff] %v1888_v3  ;;  %v1890_v11 = vadd.f32 %v1800_v4, %v3133_v5 }
 0x1b2   : > { %1953 = vst [vmem:[%s3140_s4 + $0x168] sm:$0xff] %v1889_v9  ;;  %v1891_v12 = vadd.f32 %v1802_v10, %v3135_v8 }
 0x1b3   : > { %1954 = vst [vmem:[%s3140_s4 + $0x170] sm:$0xff] %v1890_v11  ;;  %v1612_v13 = vpop.f32.mrb[48].mxu1 }
 0x1b4   : > { %1955 = vst [vmem:[%s3140_s4 + $0x178] sm:$0xff] %v1891_v12  ;;  %v1805_v14 = vpop.f32.mrb[48].mxu0  ;;  %v1614_v16 = vpop.f32.mrb[49].mxu1 }
 0x1b5   : > { %v1806_v15 = vadd.f32 %v1805_v14, %v1612_v13  ;;  %v1807_v17 = vpop.f32.mrb[49].mxu0  ;;  %v1616_v19 = vpop.f32.mrb[50].mxu1 }
 0x1b6   : > { %v1808_v18 = vadd.f32 %v1807_v17, %v1614_v16  ;;  %v1809_v20 = vpop.f32.mrb[50].mxu0  ;;  %v1618_v23 = vpop.f32.mrb[51].mxu1 }
 0x1b7   : > { %v1892_v21 = vadd.f32 %v1806_v15, %v3133_v5  ;;  %v1810_v22 = vadd.f32 %v1809_v20, %v1616_v19  ;;  %v1811_v24 = vpop.f32.mrb[51].mxu0 }
 0x1b8   : > { %v1893_v25 = vadd.f32 %v1808_v18, %v3135_v8  ;;  %v1812_v26 = vadd.f32 %v1811_v24, %v1618_v23 }
 0x1b9   : > { %1956 = vst [vmem:[%s3140_s4 + $0x180] sm:$0xff] %v1892_v21  ;;  %v1894_v27 = vadd.f32 %v1810_v22, %v3133_v5 }
 0x1ba   : > { %1957 = vst [vmem:[%s3140_s4 + $0x188] sm:$0xff] %v1893_v25  ;;  %v1895_v28 = vadd.f32 %v1812_v26, %v3135_v8 }
 0x1bb   : > { %1958 = vst [vmem:[%s3140_s4 + $0x190] sm:$0xff] %v1894_v27  ;;  %v1622_v29 = vpop.f32.mrb[52].mxu1 }
 0x1bc   : > { %1959 = vst [vmem:[%s3140_s4 + $0x198] sm:$0xff] %v1895_v28  ;;  %v1815_v30 = vpop.f32.mrb[52].mxu0  ;;  %v1624_v32 = vpop.f32.mrb[53].mxu1 }
 0x1bd   : > { %v1816_v31 = vadd.f32 %v1815_v30, %v1622_v29  ;;  %v1817_v33 = vpop.f32.mrb[53].mxu0  ;;  %v1626_v35 = vpop.f32.mrb[54].mxu1 }
 0x1be   : > { %v1818_v34 = vadd.f32 %v1817_v33, %v1624_v32  ;;  %v1819_v36 = vpop.f32.mrb[54].mxu0  ;;  %v1628_v39 = vpop.f32.mrb[55].mxu1 }
 0x1bf   : > { %v1896_v37 = vadd.f32 %v1816_v31, %v3133_v5  ;;  %v1820_v38 = vadd.f32 %v1819_v36, %v1626_v35  ;;  %v1821_v40 = vpop.f32.mrb[55].mxu0 }
 0x1c0   : > { %v1897_v41 = vadd.f32 %v1818_v34, %v3135_v8  ;;  %v1822_v42 = vadd.f32 %v1821_v40, %v1628_v39 }
 0x1c1   : > { %1960 = vst [vmem:[%s3140_s4 + $0x1a0] sm:$0xff] %v1896_v37  ;;  %v1898_v43 = vadd.f32 %v1820_v38, %v3133_v5 }
 0x1c2   : > { %1961 = vst [vmem:[%s3140_s4 + $0x1a8] sm:$0xff] %v1897_v41  ;;  %v1899_v44 = vadd.f32 %v1822_v42, %v3135_v8 }
 0x1c3   : > { %1962 = vst [vmem:[%s3140_s4 + $0x1b0] sm:$0xff] %v1898_v43  ;;  %v1632_v45 = vpop.f32.mrb[56].mxu1 }
 0x1c4   : > { %1963 = vst [vmem:[%s3140_s4 + $0x1b8] sm:$0xff] %v1899_v44  ;;  %v1825_v46 = vpop.f32.mrb[56].mxu0  ;;  %v1634_v48 = vpop.f32.mrb[57].mxu1 }
 0x1c5   : > { %v1826_v47 = vadd.f32 %v1825_v46, %v1632_v45  ;;  %v1827_v49 = vpop.f32.mrb[57].mxu0  ;;  %v1636_v51 = vpop.f32.mrb[58].mxu1 }
 0x1c6   : > { %v1828_v50 = vadd.f32 %v1827_v49, %v1634_v48  ;;  %v1829_v52 = vpop.f32.mrb[58].mxu0  ;;  %v1638_v55 = vpop.f32.mrb[59].mxu1 }
 0x1c7   : > { %v1900_v53 = vadd.f32 %v1826_v47, %v3133_v5  ;;  %v1830_v54 = vadd.f32 %v1829_v52, %v1636_v51  ;;  %v1831_v56 = vpop.f32.mrb[59].mxu0 }
 0x1c8   : > { %v1901_v57 = vadd.f32 %v1828_v50, %v3135_v8  ;;  %v1832_v58 = vadd.f32 %v1831_v56, %v1638_v55 }
 0x1c9   : > { %1964 = vst [vmem:[%s3140_s4 + $0x1c0] sm:$0xff] %v1900_v53  ;;  %v1902_v59 = vadd.f32 %v1830_v54, %v3133_v5 }
 0x1ca   : > { %1965 = vst [vmem:[%s3140_s4 + $0x1c8] sm:$0xff] %v1901_v57  ;;  %v1903_v60 = vadd.f32 %v1832_v58, %v3135_v8 }
 0x1cb   : > { %1966 = vst [vmem:[%s3140_s4 + $0x1d0] sm:$0xff] %v1902_v59  ;;  %v1642_v61 = vpop.f32.mrb[60].mxu1 }
 0x1cc   : > { %1967 = vst [vmem:[%s3140_s4 + $0x1d8] sm:$0xff] %v1903_v60  ;;  %v1835_v62 = vpop.f32.mrb[60].mxu0  ;;  %v1644_v0 = vpop.f32.mrb[61].mxu1 }
 0x1cd   : > { %v1836_v63 = vadd.f32 %v1835_v62, %v1642_v61  ;;  %v1837_v1 = vpop.f32.mrb[61].mxu0  ;;  %v1646_v3 = vpop.f32.mrb[62].mxu1 }
 0x1ce   : > { %v1838_v2 = vadd.f32 %v1837_v1, %v1644_v0  ;;  %v1839_v4 = vpop.f32.mrb[62].mxu0  ;;  %v1648_v9 = vpop.f32.mrb[63].mxu1 }
 0x1cf   : > { %v1904_v6 = vadd.f32 %v1836_v63, %v3133_v5  ;;  %v1840_v7 = vadd.f32 %v1839_v4, %v1646_v3  ;;  %v1841_v10 = vpop.f32.mrb[63].mxu0 }
 0x1d0   : > { %v1905_v11 = vadd.f32 %v1838_v2, %v3135_v8  ;;  %v1842_v12 = vadd.f32 %v1841_v10, %v1648_v9 }
 0x1d1   : > { %1968 = vst [vmem:[%s3140_s4 + $0x1e0] sm:$0xff] %v1904_v6  ;;  %v1906_v13 = vadd.f32 %v1840_v7, %v3133_v5 }
 0x1d2   : > { %1969 = vst [vmem:[%s3140_s4 + $0x1e8] sm:$0xff] %v1905_v11  ;;  %v1907_v14 = vadd.f32 %v1842_v12, %v3135_v8 }
 0x1d3   : > { %1970 = vst [vmem:[%s3140_s4 + $0x1f0] sm:$0xff] %v1906_v13 }
 0x1d4   : > { %1971 = vst [vmem:[%s3140_s4 + $0x1f8] sm:$0xff] %v1907_v14 }
 0x1d5   : > { %2578 = shalt.err (!%p2575_p8)
}
 0x1d6   : > { %s2579_s6 = scalar_lea.hbm %s3267_s15, 8192  ;;  %s2583_s27 = scalar_lea.hbm %s3329_s3, 16384 }
 0x1d7   : > { %p2580_p11 = scmp.ne.s32.totalorder %s3267_s15, %s2579_s6  ;;  %p2584_p0 = scmp.lt.u32.totalorder %s3267_s15, %s3329_s3 }
 0x1d8   : > { %p2585_p1 = scmp.lt.u32.totalorder %s2583_s27, %s2579_s6  ;;  %p2587_p3 = scmp.lt.u32.totalorder %s2579_s6, %s3267_s15 }
 0x1d9   : > { %p2581_p12 = pnand %p2580_p11, %p2708_p5 }
 0x1da   : > { %p2586_p2 = por %p2585_p1, %p2584_p0 }
 0x1db   : > { %p2582_p13 = pneg %p2581_p12 }
 0x1dc   : > { %p2588_p4 = por %p2587_p3, %p2586_p2 }
 0x1de   : > { %p2589_p6 = pnand %p2588_p4, %p2582_p13 }
 0x1e0   : > { %2592 = shalt.err (!%p2589_p6)
}
 0x1e1   : > { %s2646_s30 = smov 256   ;;  %s2647_s4 = smov 512  }
 0x1e2   : > { %s2648_s7 = smov 16  }
 0x1e3   : > { %2315 = dma.vmem_to_hbm [thread:$0]  (%p2708_p5), %s3271_s5, 8192, %s3267_s15, %s3279_s10, %s2646_s30, %s2647_s4, %s2648_s7  }
 0x1e4 PF: > { %s2004_s8 = sand.u32 1, %s2623_s12   ;;  %p2318_p7 = pnand %p2108_p10, %p2719_p9 }
 0x1e5   : > { %s2005_s9 = scalar_lea.sflag [#allocation4], %s2004_s8 }
 0x1e6   : > { %2618 = dma.done.wait (!%p2318_p7), %s2005_s9, 8192  }
 0x1e7   : > { %2620 = vsyncadd (!%p2318_p7), %s2005_s9, 4294959104  ;;  %s16_s17 = sadd.s32 1, %s2643_s17   ;;  %s3332_s12 = smov %s2627_s13 }
 0x1e8   : > { %p13_p8 = scmp.ge.s32.totalorder %s16_s17, 4   ;;  %s3333_s13 = smov %s2631_s14 }
 0x1e9   : > { %s3334_s14 = smov %s2717_s24  ;;  %s3335_s15 = smov %s2639_s16 }
 0x1ea   : > { %s3336_s16 = smov %s3338_s20  ;;  %15 = sbr.rel (!%p13_p8) target bundleno = 4 (0x4), region = 120 }
 0x1f1   :  { %2010 = vsyncpa [#allocation4], 1 }
 0x1f2   :  { %2012 = vsyncpa [#allocation4 + $0x1], 1 }

</bundles_post_ra>
